<compile_context>
chip_gen: v7x
topology: tpu7x:2x2x1
jax: 0.10.0
libtpu: 0.0.40
codegen_flags: <defaults>
</compile_context>

<pallas_src>
import jax
import jax.numpy as jnp
from jax.experimental import pallas as pl
from jax.experimental.pallas import tpu as pltpu


# ------------------------------ helpers ------------------------------------

def _round_up(n, m):
    return ((n + m - 1) // m) * m


def _vmem_budget(frac=0.75, fallback=48 * 1024 * 1024):
    """~75% of physical per-core VMEM (leaves headroom for Mosaic scratch)."""
    try:
        return int(pltpu.get_tpu_info().vmem_capacity_bytes * frac)
    except Exception:
        return fallback


def _pick_row_tile(m, max_tile=512):
    """Largest multiple of 8 dividing m and <= max_tile; else m (full axis)."""
    if m <= max_tile:
        return m
    t = (max_tile // 8) * 8
    while t >= 8:
        if m % t == 0:
            return t
        t -= 8
    return m


def _pick_patch_tile(p, max_tile=2048):
    """Largest multiple of 128 dividing p and <= max_tile; else p (full axis).

    The tile is the minor (lane) dim of the output block, so it must be a
    multiple of 128 or the full axis to keep stores unmasked and legal.
    """
    t = (min(p, max_tile) // 128) * 128
    while t >= 128:
        if p % t == 0:
            return t
        t -= 128
    return p


# ------------------- kernel A: class_embed + mask_embed ---------------------

def _embed_fused_kernel(x_ref, wc_ref, bc_ref, w1_ref, b1_ref, w2_ref, b2_ref,
                        w3_ref, b3_ref, cls_ref, me_ref):
    """Fused class_embed Linear + 3-layer mask_embed MLP; seg tokens read once."""
    x = x_ref[...].astype(jnp.bfloat16)
    # class logits (lane-padded output -> unmasked stores)
    cls_ref[...] = (jnp.dot(x, wc_ref[...], preferred_element_type=jnp.float32)
                    + bc_ref[...])
    # mask_embed MLP (ReLU between layers, none at the end)
    h = jnp.dot(x, w1_ref[...], preferred_element_type=jnp.float32) + b1_ref[...]
    h = jnp.maximum(h, 0.0).astype(jnp.bfloat16)
    h = jnp.dot(h, w2_ref[...], preferred_element_type=jnp.float32) + b2_ref[...]
    h = jnp.maximum(h, 0.0).astype(jnp.bfloat16)
    me = jnp.dot(h, w3_ref[...], preferred_element_type=jnp.float32) + b3_ref[...]
    me_ref[...] = me.astype(me_ref.dtype)


def embed_fused_pallas(x, wc, bc, w1, b1, w2, b2, w3, b3, *,
                       max_tile_m=512, vmem_limit=None):
    """x: (M, K); returns (cls (M, Nc_pad) f32, mask_embed (M, Nm_pad) bf16)."""
    M, K = x.shape
    Nc, H1, H2, Nm = wc.shape[1], w1.shape[1], w2.shape[1], w3.shape[1]
    tm = _pick_row_tile(M, max_tile_m)

    def rep(shape):  # replicated (weight/bias) block
        return pl.BlockSpec(shape, lambda i: (0,) * len(shape))

    return pl.pallas_call(
        _embed_fused_kernel,
        out_shape=(jax.ShapeDtypeStruct((M, Nc), jnp.float32),
                   jax.ShapeDtypeStruct((M, Nm), jnp.bfloat16)),
        grid=(M // tm,),
        in_specs=[pl.BlockSpec((tm, K), lambda i: (i, 0)),
                  rep((K, Nc)), rep((1, Nc)),
                  rep((K, H1)), rep((1, H1)),
                  rep((H1, H2)), rep((1, H2)),
                  rep((H2, Nm)), rep((1, Nm))],
        out_specs=(pl.BlockSpec((tm, Nc), lambda i: (i, 0)),
                   pl.BlockSpec((tm, Nm), lambda i: (i, 0))),
        compiler_params=pltpu.CompilerParams(
            dimension_semantics=("parallel",),
            vmem_limit_bytes=vmem_limit),
    )(x, wc, bc, w1, b1, w2, b2, w3, b3)


# -------- kernel B: fused pixel encoder + mask einsum (patch resolution) ----

def _make_fused_mask_kernel(n_layers, tp, patch_start_idx):
    def kernel(*refs):
        me_ref, wp_ref, bp_ref, wo_ref, bo_ref = refs[:5]
        tok_refs = refs[5:5 + n_layers]               # HBM (B,S,T,K), pl.ANY
        o_ref = refs[5 + n_layers]                    # (LQ, tp) bf16
        buf = refs[6 + n_layers]                      # VMEM (2*n_layers, tp, K)
        sem = refs[7 + n_layers]                      # DMA sems (2*n_layers,)

        b = pl.program_id(0)
        s = pl.program_id(1)
        p = pl.program_id(2)
        n_p = pl.num_programs(2)
        slot = p % 2

        def tok_copy(layer, p_idx, sl):
            start = patch_start_idx + p_idx * tp      # element offset along T
            idx = sl * n_layers + layer
            return pltpu.make_async_copy(
                tok_refs[layer].at[b, s, pl.ds(start, tp), :],
                buf.at[idx],
                sem.at[idx])

        # Prime the pipeline on the first patch-tile of each (b, s) frame.
        @pl.when(p == 0)
        def _():
            for layer in range(n_layers):
                tok_copy(layer, p, slot).start()

        # Prefetch the next patch-tile of this frame into the other slot.
        @pl.when(p + 1 < n_p)
        def _():
            for layer in range(n_layers):
                tok_copy(layer, p + 1, 1 - slot).start()

        # Wait for the current tile's token DMAs.
        for layer in range(n_layers):
            tok_copy(layer, p, slot).wait()

        # --- pixel encoder (approx. DPT hot path) at patch resolution ---
        acc = jnp.dot(buf[slot * n_layers].astype(jnp.bfloat16), wp_ref[0],
                      preferred_element_type=jnp.float32)
        for layer in range(1, n_layers):
            acc = acc + jnp.dot(buf[slot * n_layers + layer].astype(jnp.bfloat16),
                                wp_ref[layer], preferred_element_type=jnp.float32)
        h = jnp.maximum(acc + bp_ref[...], 0.0).astype(jnp.bfloat16)
        feat = (jnp.dot(h, wo_ref[...], preferred_element_type=jnp.float32)
                + bo_ref[...])                        # (tp, F) f32

        # --- mask einsum: (L*Q, C) x (tp, C) contracted on C -> (L*Q, tp) ---
        masks = jax.lax.dot_general(
            me_ref[...], feat.astype(jnp.bfloat16),
            dimension_numbers=(((1,), (1,)), ((), ())),
            preferred_element_type=jnp.float32)
        o_ref[...] = masks.astype(o_ref.dtype)        # bf16, lane-dense on tp

    return kernel


def fused_mask_pallas(mask_embed_r, tok_list, wp, bp_sum, wo, bo,
                      patch_start_idx, P, *, max_tile_p=2048, vmem_limit=None):
    """mask_embed_r: (B, L*Q, C) bf16;  tok_list: Lenc x (B, S, T, K) (unsliced).
    Returns masks at patch resolution: (B, S, L*Q, P) bf16."""
    n_layers = len(tok_list)
    B, LQ, F = mask_embed_r.shape
    _, S, T, K = tok_list[0].shape
    tp = _pick_patch_tile(P, max_tile_p)
    assert P % tp == 0

    in_specs = [pl.BlockSpec((None, LQ, F), lambda b, s, p: (b, 0, 0)),
                pl.BlockSpec((n_layers, K, F), lambda b, s, p: (0, 0, 0)),
                pl.BlockSpec((1, F), lambda b, s, p: (0, 0)),
                pl.BlockSpec((F, F), lambda b, s, p: (0, 0)),
                pl.BlockSpec((1, F), lambda b, s, p: (0, 0))]
    in_specs += [pl.BlockSpec(memory_space=pl.ANY)] * n_layers

    return pl.pallas_call(
        _make_fused_mask_kernel(n_layers, tp, patch_start_idx),
        out_shape=jax.ShapeDtypeStruct((B, S, LQ, P), jnp.bfloat16),
        grid=(B, S, P // tp),
        in_specs=in_specs,
        out_specs=pl.BlockSpec((None, None, LQ, tp), lambda b, s, p: (b, s, 0, p)),
        scratch_shapes=[pltpu.VMEM((2 * n_layers, tp, K), tok_list[0].dtype),
                        pltpu.SemaphoreType.DMA((2 * n_layers,))],
        compiler_params=pltpu.CompilerParams(
            dimension_semantics=("parallel", "parallel", "arbitrary"),
            vmem_limit_bytes=vmem_limit),
    )(mask_embed_r, wp, bp_sum, wo, bo, *tok_list)


# ------------------------------- SegHead ----------------------------------

class SegHeadPallas:
    def __init__(self, dim_in, patch_size=4, hidden_size=32, dim_mask=16,
                 num_classes=10, n_enc_layers=4, key=jax.random.PRNGKey(42)):
        self.dim_in = dim_in
        self.patch_size = patch_size
        self.hidden_size = hidden_size
        self.dim_mask = dim_mask
        self.num_classes = num_classes
        self.n_enc_layers = n_enc_layers
        self.vmem_limit = _vmem_budget()

        ncls = num_classes + 1
        self.ncls = ncls
        self.ncls_pad = _round_up(ncls, 128)     # lane-dense output slab
        self.dmask_pad = _round_up(dim_mask, 128)

        ks = jax.random.split(key, 12)
        sc = 0.02

        def pad_cols(a, n):
            return jnp.pad(a, ((0, 0), (0, n - a.shape[1])))

        # class_embed: Linear(dim_in, num_classes + 1)  (padded to 128 lanes)
        wc = sc * jax.random.normal(ks[0], (dim_in, ncls), jnp.float32)
        bc = sc * jax.random.normal(ks[1], (1, ncls), jnp.float32)
        self.wc = pad_cols(wc, self.ncls_pad).astype(jnp.bfloat16)
        self.bc = pad_cols(bc, self.ncls_pad)                       # f32

        # mask_embed: MLP_maskformer(dim_in, hidden_size, dim_mask, 3)
        self.w1 = (sc * jax.random.normal(ks[2], (dim_in, hidden_size), jnp.float32)
                   ).astype(jnp.bfloat16)
        self.b1 = sc * jax.random.normal(ks[3], (1, hidden_size), jnp.float32)
        self.w2 = (sc * jax.random.normal(ks[4], (hidden_size, hidden_size), jnp.float32)
                   ).astype(jnp.bfloat16)
        self.b2 = sc * jax.random.normal(ks[5], (1, hidden_size), jnp.float32)
        w3 = sc * jax.random.normal(ks[6], (hidden_size, dim_mask), jnp.float32)
        b3 = sc * jax.random.normal(ks[7], (1, dim_mask), jnp.float32)
        self.w3 = pad_cols(w3, self.dmask_pad).astype(jnp.bfloat16)
        self.b3 = pad_cols(b3, self.dmask_pad)                      # f32

        # pixel_encoder (simplified DPTHead; dim_in = 2 * dim_in, features = dim_mask)
        self.wp = (sc * jax.random.normal(
            ks[8], (n_enc_layers, 2 * dim_in, dim_mask), jnp.float32)).astype(jnp.bfloat16)
        bp = sc * jax.random.normal(ks[9], (n_enc_layers, 1, dim_mask), jnp.float32)
        self.bp_sum = jnp.sum(bp, axis=0)                           # (1, F) f32
        self.wo = (sc * jax.random.normal(
            ks[10], (dim_mask, dim_mask), jnp.float32)).astype(jnp.bfloat16)
        self.bo = sc * jax.random.normal(ks[11], (1, dim_mask), jnp.float32)

    def __call__(self, aggregated_tokens_list, images, patch_start_idx,
                 aggregated_seg_tokens_list):
        B, S, _, H, W = images.shape
        ps = self.patch_size
        hp, wp_ = H // ps, W // ps
        P = hp * wp_

        seg_tokens = jnp.stack(aggregated_seg_tokens_list, axis=0)
        L, _, Q, Cin = seg_tokens.shape

        # ---- fused class_embed + mask_embed over all (l, b, q) rows ----
        x_flat = seg_tokens.reshape(L * B * Q, Cin).astype(jnp.float32)
        cls_pad, me_pad = embed_fused_pallas(
            x_flat, self.wc, self.bc, self.w1, self.b1, self.w2, self.b2,
            self.w3, self.b3, vmem_limit=self.vmem_limit)
        outputs_class = cls_pad[:, :self.ncls].reshape(L, B, Q, self.ncls)
        mask_embed = me_pad[:, :self.dim_mask].reshape(L, B, Q, self.dim_mask)

        # tiny (L,B,Q,F) -> (B, L*Q, F) reorder (L folded into the matmul M dim)
        mask_embed_r = jnp.transpose(mask_embed, (1, 0, 2, 3)
                                     ).reshape(B, L * Q, self.dim_mask)

        # ---- fused pixel encoder + einsum('lbqc,bschw->lbsqhw') at patch res ----
        # Tokens go in UNSLICED; patch_start_idx is applied by the in-kernel DMA.
        masks_patch = fused_mask_pallas(
            mask_embed_r, list(aggregated_tokens_list), self.wp, self.bp_sum,
            self.wo, self.bo, patch_start_idx, P,
            vmem_limit=self.vmem_limit)                 # (B, S, L*Q, P) bf16

        # ---- per-layer slice at PATCH resolution + single-pass nearest upsample
        masks_r = masks_patch.reshape(B, S, L, Q, hp, wp_)

        def upsample(mp):  # (B,S,Q,hp,wp) -> (B,S,Q,H,W), one broadcast pass
            m = mp.reshape(B, S, Q, hp, 1, wp_, 1)
            m = jnp.broadcast_to(m, (B, S, Q, hp, ps, wp_, ps))
            return m.reshape(B, S, Q, H, W)

        masks_layers = [upsample(masks_r[:, :, l]) for l in range(L)]

        out = {
            'pred_logits': outputs_class[-1],          # (B, Q, num_classes+1) f32
            'pred_masks': masks_layers[-1],            # (B, S, Q, H, W) bf16
            'aux_outputs': [{'pred_logits': outputs_class[l],
                             'pred_masks': masks_layers[l]}
                            for l in range(L - 1)],
        }
        return out


# --------------------------------- main ------------------------------------

if __name__ == "__main__":
    key = jax.random.PRNGKey(0)

    # Small, consistent shapes.
    B, S = 1, 2
    H = W = 16
    dim_in = 32
    patch_size = 4
    hidden_size = 32
    dim_mask = 16
    num_classes = 10
    n_enc_layers = 4       # number of backbone layers feeding the pixel encoder
    L = 3                  # number of seg-decoder layers
    Q = 8                  # number of query tokens
    patch_start_idx = 1
    P = (H // patch_size) * (W // patch_size)
    T = patch_start_idx + P   # total tokens per frame (camera token + patches)

    keys = jax.random.split(key, 2 + n_enc_layers + L)
    images = jax.random.normal(keys[0], (B, S, 3, H, W), jnp.float32)

    aggregated_tokens_list = [
        jax.random.normal(keys[1 + i], (B, S, T, 2 * dim_in), jnp.float32)
        for i in range(n_enc_layers)
    ]
    aggregated_seg_tokens_list = [
        jax.random.normal(keys[1 + n_enc_layers + i], (B, Q, dim_in), jnp.float32)
        for i in range(L)
    ]

    head = SegHeadPallas(dim_in=dim_in, patch_size=patch_size,
                         hidden_size=hidden_size, dim_mask=dim_mask,
                         num_classes=num_classes, n_enc_layers=n_enc_layers,
                         key=jax.random.PRNGKey(1))

    out = head(aggregated_tokens_list, images, patch_start_idx,
               aggregated_seg_tokens_list)
    out = jax.block_until_ready(out)

    assert out['pred_logits'].shape == (B, Q, num_classes + 1)
    assert out['pred_masks'].shape == (B, S, Q, H, W)
    assert len(out['aux_outputs']) == L - 1
    assert jnp.all(jnp.isfinite(out['pred_masks'].astype(jnp.float32)))
    assert jnp.all(jnp.isfinite(out['pred_logits']))

    print("KERNEL_OK")
</pallas_src>

<mosaic_0001>
module attributes {stable_mosaic.version = 11 : i64} {
  func.func @_embed_fused_kernel(%arg0: i32, %arg1: memref<24x32xf32, #tpu.memory_space<vmem>>, %arg2: memref<32x128xbf16, #tpu.memory_space<vmem>>, %arg3: memref<1x128xf32, #tpu.memory_space<vmem>>, %arg4: memref<32x32xbf16, #tpu.memory_space<vmem>>, %arg5: memref<1x32xf32, #tpu.memory_space<vmem>>, %arg6: memref<32x32xbf16, #tpu.memory_space<vmem>>, %arg7: memref<1x32xf32, #tpu.memory_space<vmem>>, %arg8: memref<32x128xbf16, #tpu.memory_space<vmem>>, %arg9: memref<1x128xf32, #tpu.memory_space<vmem>>, %arg10: memref<24x128xf32, #tpu.memory_space<vmem>>, %arg11: memref<24x128xbf16, #tpu.memory_space<vmem>>) attributes {dimension_semantics = [#tpu.dimension_semantics<parallel>], iteration_bounds = array<i64: 1>, scalar_prefetch = 0 : i64, scratch_operands = 0 : i64, tpu.core_type = #tpu.core_type<tc>, window_params = [{transform_indices = @transform_0, window_bounds = array<i64: 24, 32>}, {pipeline_mode = #tpu.pipeline_mode<synchronous>, transform_indices = @transform_1, window_bounds = array<i64: 32, 128>}, {pipeline_mode = #tpu.pipeline_mode<synchronous>, transform_indices = @transform_2, window_bounds = array<i64: 1, 128>}, {pipeline_mode = #tpu.pipeline_mode<synchronous>, transform_indices = @transform_3, window_bounds = array<i64: 32, 32>}, {pipeline_mode = #tpu.pipeline_mode<synchronous>, transform_indices = @transform_4, window_bounds = array<i64: 1, 32>}, {pipeline_mode = #tpu.pipeline_mode<synchronous>, transform_indices = @transform_5, window_bounds = array<i64: 32, 32>}, {pipeline_mode = #tpu.pipeline_mode<synchronous>, transform_indices = @transform_6, window_bounds = array<i64: 1, 32>}, {pipeline_mode = #tpu.pipeline_mode<synchronous>, transform_indices = @transform_7, window_bounds = array<i64: 32, 128>}, {pipeline_mode = #tpu.pipeline_mode<synchronous>, transform_indices = @transform_8, window_bounds = array<i64: 1, 128>}, {transform_indices = @transform_9, window_bounds = array<i64: 24, 128>}, {transform_indices = @transform_10, window_bounds = array<i64: 24, 128>}]} {
    %c0 = arith.constant 0 : index
    %c0_0 = arith.constant 0 : index
    %0 = vector.load %arg1[%c0, %c0_0] : memref<24x32xf32, #tpu.memory_space<vmem>>, vector<24x32xf32>
    %1 = arith.truncf %0 : vector<24x32xf32> to vector<24x32xbf16>
    %c0_1 = arith.constant 0 : index
    %c0_2 = arith.constant 0 : index
    %2 = vector.load %arg2[%c0_1, %c0_2] : memref<32x128xbf16, #tpu.memory_space<vmem>>, vector<32x128xbf16>
    %cst = arith.constant dense<0.000000e+00> : vector<24x128xf32>
    %3 = tpu.matmul %1, %2, %cst {dimension_numbers = #tpu.dot_dimension_numbers<[1], [0], [0], [1], [0, 0, 1, 1], [], []>} : vector<24x32xbf16>, vector<32x128xbf16>, vector<24x128xf32> -> vector<24x128xf32>
    %c0_3 = arith.constant 0 : index
    %c0_4 = arith.constant 0 : index
    %4 = vector.load %arg3[%c0_3, %c0_4] : memref<1x128xf32, #tpu.memory_space<vmem>>, vector<1x128xf32>
    %5 = vector.broadcast %4 : vector<1x128xf32> to vector<24x128xf32>
    %6 = arith.addf %3, %5 : vector<24x128xf32>
    %c0_5 = arith.constant 0 : index
    %c0_6 = arith.constant 0 : index
    %7 = vector.load %arg10[%c0_5, %c0_6] : memref<24x128xf32, #tpu.memory_space<vmem>>, vector<24x128xf32>
    tpu.vector_store %arg10[%c0_5, %c0_6], %6 {strides = array<i32>} : memref<24x128xf32, #tpu.memory_space<vmem>>, vector<24x128xf32>,
    %c0_7 = arith.constant 0 : index
    %c0_8 = arith.constant 0 : index
    %8 = vector.load %arg4[%c0_7, %c0_8] : memref<32x32xbf16, #tpu.memory_space<vmem>>, vector<32x32xbf16>
    %cst_9 = arith.constant dense<0.000000e+00> : vector<24x32xf32>
    %9 = tpu.matmul %1, %8, %cst_9 {dimension_numbers = #tpu.dot_dimension_numbers<[1], [0], [0], [1], [0, 0, 1, 1], [], []>} : vector<24x32xbf16>, vector<32x32xbf16>, vector<24x32xf32> -> vector<24x32xf32>
    %c0_10 = arith.constant 0 : index
    %c0_11 = arith.constant 0 : index
    %10 = vector.load %arg5[%c0_10, %c0_11] : memref<1x32xf32, #tpu.memory_space<vmem>>, vector<1x32xf32>
    %11 = vector.broadcast %10 : vector<1x32xf32> to vector<24x32xf32>
    %12 = arith.addf %9, %11 : vector<24x32xf32>
    %cst_12 = arith.constant 0.000000e+00 : f32
    %13 = vector.broadcast %cst_12 : f32 to vector<24x32xf32>
    %14 = arith.maximumf %12, %13 : vector<24x32xf32>
    %15 = arith.truncf %14 : vector<24x32xf32> to vector<24x32xbf16>
    %c0_13 = arith.constant 0 : index
    %c0_14 = arith.constant 0 : index
    %16 = vector.load %arg6[%c0_13, %c0_14] : memref<32x32xbf16, #tpu.memory_space<vmem>>, vector<32x32xbf16>
    %cst_15 = arith.constant dense<0.000000e+00> : vector<24x32xf32>
    %17 = tpu.matmul %15, %16, %cst_15 {dimension_numbers = #tpu.dot_dimension_numbers<[1], [0], [0], [1], [0, 0, 1, 1], [], []>} : vector<24x32xbf16>, vector<32x32xbf16>, vector<24x32xf32> -> vector<24x32xf32>
    %c0_16 = arith.constant 0 : index
    %c0_17 = arith.constant 0 : index
    %18 = vector.load %arg7[%c0_16, %c0_17] : memref<1x32xf32, #tpu.memory_space<vmem>>, vector<1x32xf32>
    %19 = vector.broadcast %18 : vector<1x32xf32> to vector<24x32xf32>
    %20 = arith.addf %17, %19 : vector<24x32xf32>
    %cst_18 = arith.constant 0.000000e+00 : f32
    %21 = vector.broadcast %cst_18 : f32 to vector<24x32xf32>
    %22 = arith.maximumf %20, %21 : vector<24x32xf32>
    %23 = arith.truncf %22 : vector<24x32xf32> to vector<24x32xbf16>
    %c0_19 = arith.constant 0 : index
    %c0_20 = arith.constant 0 : index
    %24 = vector.load %arg8[%c0_19, %c0_20] : memref<32x128xbf16, #tpu.memory_space<vmem>>, vector<32x128xbf16>
    %cst_21 = arith.constant dense<0.000000e+00> : vector<24x128xf32>
    %25 = tpu.matmul %23, %24, %cst_21 {dimension_numbers = #tpu.dot_dimension_numbers<[1], [0], [0], [1], [0, 0, 1, 1], [], []>} : vector<24x32xbf16>, vector<32x128xbf16>, vector<24x128xf32> -> vector<24x128xf32>
    %c0_22 = arith.constant 0 : index
    %c0_23 = arith.constant 0 : index
    %26 = vector.load %arg9[%c0_22, %c0_23] : memref<1x128xf32, #tpu.memory_space<vmem>>, vector<1x128xf32>
    %27 = vector.broadcast %26 : vector<1x128xf32> to vector<24x128xf32>
    %28 = arith.addf %25, %27 : vector<24x128xf32>
    %29 = arith.truncf %28 : vector<24x128xf32> to vector<24x128xbf16>
    %c0_24 = arith.constant 0 : index
    %c0_25 = arith.constant 0 : index
    %30 = vector.load %arg11[%c0_24, %c0_25] : memref<24x128xbf16, #tpu.memory_space<vmem>>, vector<24x128xbf16>
    tpu.vector_store %arg11[%c0_24, %c0_25], %29 {strides = array<i32>} : memref<24x128xbf16, #tpu.memory_space<vmem>>, vector<24x128xbf16>,
    return
  }
  func.func @transform_0(%arg0: i32) -> (i32, i32) {
    %c0_i32 = arith.constant 0 : i32
    %c0_i32_0 = arith.constant 0 : i32
    return %arg0, %c0_i32 : i32, i32
  }
  func.func @transform_1(%arg0: i32) -> (i32, i32) {
    %c0_i32 = arith.constant 0 : i32
    %c0_i32_0 = arith.constant 0 : i32
    %c0_i32_1 = arith.constant 0 : i32
    return %c0_i32, %c0_i32_0 : i32, i32
  }
  func.func @transform_2(%arg0: i32) -> (i32, i32) {
    %c0_i32 = arith.constant 0 : i32
    %c0_i32_0 = arith.constant 0 : i32
    %c0_i32_1 = arith.constant 0 : i32
    return %c0_i32, %c0_i32_0 : i32, i32
  }
  func.func @transform_3(%arg0: i32) -> (i32, i32) {
    %c0_i32 = arith.constant 0 : i32
    %c0_i32_0 = arith.constant 0 : i32
    %c0_i32_1 = arith.constant 0 : i32
    return %c0_i32, %c0_i32_0 : i32, i32
  }
  func.func @transform_4(%arg0: i32) -> (i32, i32) {
    %c0_i32 = arith.constant 0 : i32
    %c0_i32_0 = arith.constant 0 : i32
    %c0_i32_1 = arith.constant 0 : i32
    return %c0_i32, %c0_i32_0 : i32, i32
  }
  func.func @transform_5(%arg0: i32) -> (i32, i32) {
    %c0_i32 = arith.constant 0 : i32
    %c0_i32_0 = arith.constant 0 : i32
    %c0_i32_1 = arith.constant 0 : i32
    return %c0_i32, %c0_i32_0 : i32, i32
  }
  func.func @transform_6(%arg0: i32) -> (i32, i32) {
    %c0_i32 = arith.constant 0 : i32
    %c0_i32_0 = arith.constant 0 : i32
    %c0_i32_1 = arith.constant 0 : i32
    return %c0_i32, %c0_i32_0 : i32, i32
  }
  func.func @transform_7(%arg0: i32) -> (i32, i32) {
    %c0_i32 = arith.constant 0 : i32
    %c0_i32_0 = arith.constant 0 : i32
    %c0_i32_1 = arith.constant 0 : i32
    return %c0_i32, %c0_i32_0 : i32, i32
  }
  func.func @transform_8(%arg0: i32) -> (i32, i32) {
    %c0_i32 = arith.constant 0 : i32
    %c0_i32_0 = arith.constant 0 : i32
    %c0_i32_1 = arith.constant 0 : i32
    return %c0_i32, %c0_i32_0 : i32, i32
  }
  func.func @transform_9(%arg0: i32) -> (i32, i32) {
    %c0_i32 = arith.constant 0 : i32
    %c0_i32_0 = arith.constant 0 : i32
    return %arg0, %c0_i32 : i32, i32
  }
  func.func @transform_10(%arg0: i32) -> (i32, i32) {
    %c0_i32 = arith.constant 0 : i32
    %c0_i32_0 = arith.constant 0 : i32
    return %arg0, %c0_i32 : i32, i32
  }
}

</mosaic_0001>

<bundles_post_ra>
// kernel: tpu_custom_call.1
= control target key start
LH: loop header
LB: loop body
LE: loop exit
PB: predicated region body
PF: predicated region fallthrough
CT: control target
= control target key end

     0   :  { %16 = vsyncpa [#allocation3], 0  ;;  %s891_s0 = inlined_call_operand.hbm [shape: f32[24,32], index: 0, kind: input, shape index: {}]   ;;  %s892_s1 = inlined_call_operand.hbm [shape: bf16[32,128], index: 1, kind: input, shape index: {}]   ;;  %s893_s2 = inlined_call_operand.vmem [shape: f32[1,128], index: 2, kind: input, shape index: {}]   ;;  %s894_s3 = inlined_call_operand.hbm [shape: bf16[32,32], index: 3, kind: input, shape index: {}]   ;;  %s895_s4 = inlined_call_operand.vmem [shape: f32[1,32], index: 4, kind: input, shape index: {}]   ;;  %s896_s5 = inlined_call_operand.vmem [shape: bf16[32,32], index: 5, kind: input, shape index: {}]   ;;  %s897_s6 = inlined_call_operand.vmem [shape: f32[1,32], index: 6, kind: input, shape index: {}]   ;;  %s898_s7 = inlined_call_operand.hbm [shape: bf16[32,128], index: 7, kind: input, shape index: {}]   ;;  %s899_s8 = inlined_call_operand.vmem [shape: f32[1,128], index: 8, kind: input, shape index: {}]   ;;  %s900_s9 = inlined_call_operand.hbm [shape: f32[24,128], index: 9, kind: output, shape index: {0}]   ;;  %s901_s10 = inlined_call_operand.hbm [shape: bf16[24,128], index: 10, kind: output, shape index: {1}]  }
   0x1   :  { %17 = vsyncpa [#allocation6], 0 }
   0x2   :  { %18 = vsyncpa [#allocation9], 0 }
   0x3   :  { %19 = vsyncpa [#allocation4], 0 }
   0x4   :  { %20 = vsyncpa [#allocation12], 0  ;;  %s703_s13 = smov [#allocation5]   ;;  %s561_s17 = scalar_lea.hbm %s892_s1, 256 }
   0x5   :  { %s38_s14 = sshll.u32 %s703_s13, 4  ;;  %p562_p0 = scmp.ne.s32.totalorder %s892_s1, %s561_s17  ;;  %s39_s14 = int_to_ptr.vmem [resolvable:$true] %s38_s14 }
   0x6   :  { %p565_p1 = scmp.lt.u32.totalorder %s561_s17, %s892_s1 }
   0x8   :  { %p567_p2 = pnand %p565_p1, %p562_p0 }
   0xa   :  { %570 = shalt.err (!%p567_p2)
}
   0xb   :  { %s571_s22 = scalar_lea.vmem %s39_s14, 256  ;;  %p576_p4 = scmp.lt.s32.totalorder %s39_s14, %s39_s14 }
   0xc   :  { %p572_p3 = scmp.ne.s32.totalorder %s39_s14, %s571_s22  ;;  %p577_p5 = scmp.lt.s32.totalorder %s571_s22, %s571_s22 }
   0xe   :  { %p578_p6 = por %p577_p5, %p576_p4 }
  0x10   :  { %p579_p7 = pnand %p578_p6, %p572_p3 }
  0x12   :  { %582 = shalt.err (!%p579_p7)
}
  0x13   :  { %s704_s23 = smov 64   ;;  %s705_s24 = smov 4  }
  0x14   :  { %44 = dma.hbm_to_vmem [thread:$0]  %s892_s1, 256, %s39_s14, [#allocation6], %s704_s23, %s704_s23, %s705_s24  }
  0x15   :  { %s706_s27 = smov [#allocation2]   ;;  %s583_s11 = scalar_lea.hbm %s891_s0, 384 }
  0x16   :  { %s26_s28 = sshll.u32 %s706_s27, 4  ;;  %p584_p8 = scmp.ne.s32.totalorder %s891_s0, %s583_s11  ;;  %s27_s28 = int_to_ptr.vmem [resolvable:$true] %s26_s28 }
  0x17   :  { %p587_p9 = scmp.lt.u32.totalorder %s583_s11, %s891_s0 }
  0x19   :  { %p589_p10 = pnand %p587_p9, %p584_p8 }
  0x1b   :  { %592 = shalt.err (!%p589_p10)
}
  0x1c   :  { %s593_s17 = scalar_lea.vmem %s27_s28, 384  ;;  %p598_p12 = scmp.lt.s32.totalorder %s27_s28, %s27_s28 }
  0x1d   :  { %p594_p11 = scmp.ne.s32.totalorder %s27_s28, %s593_s17  ;;  %p599_p13 = scmp.lt.s32.totalorder %s593_s17, %s593_s17 }
  0x1f   :  { %p600_p0 = por %p599_p13, %p598_p12 }
  0x21   :  { %p601_p1 = pnand %p600_p0, %p594_p11 }
  0x23   :  { %604 = shalt.err (!%p601_p1)
}
  0x24   :  { %s707_s1 = smov 128   ;;  %s708_s14 = smov 8  }
  0x25   :  { %32 = dma.hbm_to_vmem [thread:$0]  %s891_s0, 384, %s27_s28, [#allocation3], %s707_s1, %s707_s1, %s708_s14  }
  0x26   :  { %s709_s20 = smov [#allocation7]   ;;  %s710_s22 = smov [#allocation8]  }
  0x27   :  { %s52_s21 = sshll.u32 %s709_s20, 4  ;;  %s70_s25 = sshll.u32 %s710_s22, 4  ;;  %s53_s21 = int_to_ptr.vmem [resolvable:$true] %s52_s21  ;;  %s798_s25 = int_to_ptr.vmem [resolvable:$true] %s70_s25 }
  0x28   :  { %s605_s29 = scalar_lea.hbm %s894_s3, 256 }
  0x29   :  { %p606_p2 = scmp.ne.s32.totalorder %s894_s3, %s605_s29  ;;  %p609_p3 = scmp.lt.u32.totalorder %s605_s29, %s894_s3 }
  0x2b   :  { %p611_p4 = pnand %p609_p3, %p606_p2 }
  0x2d   :  { %614 = shalt.err (!%p611_p4)
}
  0x2e   :  { %s615_s0 = scalar_lea.vmem %s53_s21, 256  ;;  %p620_p6 = scmp.lt.s32.totalorder %s53_s21, %s53_s21 }
  0x2f   :  { %p616_p5 = scmp.ne.s32.totalorder %s53_s21, %s615_s0  ;;  %p621_p7 = scmp.lt.s32.totalorder %s615_s0, %s615_s0 }
  0x31   :  { %p622_p8 = por %p621_p7, %p620_p6 }
  0x33   :  { %p623_p9 = pnand %p622_p8, %p616_p5 }
  0x35   :  { %626 = shalt.err (!%p623_p9)
}
  0x36   :  { %58 = dma.hbm_to_vmem [thread:$0]  %s894_s3, 256, %s53_s21, [#allocation6], %s704_s23, %s704_s23, %s705_s24  }
  0x37   :  { %s627_s18 = scalar_lea.hbm %s898_s7, 256 }
  0x38   :  { %p628_p10 = scmp.ne.s32.totalorder %s898_s7, %s627_s18  ;;  %p631_p11 = scmp.lt.u32.totalorder %s627_s18, %s898_s7 }
  0x3a   :  { %p633_p12 = pnand %p631_p11, %p628_p10 }
  0x3c   :  { %636 = shalt.err (!%p633_p12)
}
  0x3d   :  { %s637_s27 = scalar_lea.vmem %s798_s25, 256  ;;  %p642_p0 = scmp.lt.s32.totalorder %s798_s25, %s798_s25 }
  0x3e   :  { %p638_p13 = scmp.ne.s32.totalorder %s798_s25, %s637_s27  ;;  %p643_p1 = scmp.lt.s32.totalorder %s637_s27, %s637_s27 }
  0x40   :  { %p644_p2 = por %p643_p1, %p642_p0 }
  0x42   :  { %p645_p3 = pnand %p644_p2, %p638_p13 }
  0x44   :  { %648 = shalt.err (!%p645_p3)
}
  0x45   :  { %76 = dma.hbm_to_vmem [thread:$0]  %s898_s7, 256, %s798_s25, [#allocation9], %s704_s23, %s704_s23, %s705_s24  }
  0x46   :  { %693 = dma.done.wait [#allocation3], 384  }
  0x47   :  { %694 = vsyncadd [#allocation3], 4294966912 }
  0x48   :  { %695 = dma.done.wait [#allocation6], 512  }
  0x49   :  { %696 = vsyncadd [#allocation6], 4294966784 }
  0x4a   :  { %697 = dma.done.wait [#allocation9], 256  }
  0x4b   :  { %698 = vsyncadd [#allocation9], 4294967040  ;;  %v553_v0 = vld [vmem:[#allocation7] sm:$0xff]   ;;  %v554_v1 = vld [vmem:[#allocation7 + $0x8] sm:$0xff]   ;;  %vm120_vm0 = vcmask 261120  }
  0x4c   :  { %519 = vmatprep.subr.bf16.mxu1 %v553_v0  ;;  %v92_v2 = vld [vmem:[#allocation2] sm:$0xff]  ;;  %v93_v3 = vld [vmem:[#allocation2 + $0x8] sm:$0xff]  ;;  %v94_v4 = vld [vmem:[#allocation2 + $0x10] sm:$0xff] }
  0x4d   :  { %520 = vmatpush3.bf16.msra.mxu1 %v553_v0  ;;  %v95_v5 = vpack.c.bf16 %v93_v3, %v92_v2  ;;  %v555_v6 = vld [vmem:[#allocation5] sm:$0xff]   ;;  %v556_v7 = vld [vmem:[#allocation5 + $0x8] sm:$0xff]   ;;  %v96_v8 = vpack.c.bf16 %v94_v4, %v94_v4  ;;  %v558_v10 = vld [vmem:[%s896_s5 + $0x8] sm:$0xff]  }
  0x4e   :  { %521 = vmatprep.subr.bf16.mxu1 %v554_v1  ;;  %511 = vmatprep.subr.bf16.mxu0 %v555_v6  ;;  %v557_v9 = vld [vmem:[%s896_s5] sm:$0xff]   ;;  %v559_v32 = vld [vmem:[#allocation8] sm:$0xff]   ;;  %s711_s5 = smov [#allocation10]  }
  0x4f   :  { %523 = vmatprep.mubr.msk.bf16.mxu1 %vm120_vm0, %v95_v5  ;;  %512 = vmatpush3.bf16.msra.mxu0 %v555_v6  ;;  %v469_v11 = vld [vmem:[%s895_s4] ss:$0 sm:$0xff]  ;;  %s434_s28 = sshll.u32 %s711_s5, 4  ;;  %s435_s28 = int_to_ptr.vmem [resolvable:$true] %s434_s28 }
  0x50   :  { %515 = vmatprep.mubr.msk.bf16.mxu0 %vm120_vm0, %v95_v5  ;;  %513 = vmatprep.subr.bf16.mxu0 %v556_v7  ;;  %v464_v15 = vld [vmem:[%s893_s2] ss:$0 sm:$0xff]  ;;  %p654_p5 = scmp.lt.s32.totalorder %s435_s28, %s435_s28 }
  0x51   :  { %522 = vmatpush3.bf16.msra.mxu1 %v554_v1  ;;  %v560_v33 = vld [vmem:[#allocation8 + $0x8] sm:$0xff]  }
  0x52   :  { %535 = vmatprep.subr.bf16.mxu1 %v559_v32  ;;  %v474_v34 = vld [vmem:[%s897_s6] ss:$0 sm:$0xff]  ;;  %s649_s6 = scalar_lea.vmem %s435_s28, 384 }
  0x53   :  { %514 = vmatpush3.bf16.msra.mxu0 %v556_v7  ;;  %p650_p4 = scmp.ne.s32.totalorder %s435_s28, %s649_s6  ;;  %p655_p6 = scmp.lt.s32.totalorder %s649_s6, %s649_s6 }
  0x54   :  { %524 = vmatmul.mubr.msk.bf16.vlgmr.msra.gmra.mrb[0].mxu1 %vm120_vm0, %v96_v8  ;;  %527 = vmatprep.subr.bf16.mxu0 %v557_v9 }
  0x55   :  { %536 = vmatpush3.bf16.msra.mxu1 %v559_v32  ;;  %p656_p7 = por %p655_p6, %p654_p5 }
  0x56   :  { %516 = vmatmul.mubr.msk.bf16.vlgmr.msra.gmra.mrb[0].mxu0 %vm120_vm0, %v96_v8  ;;  %537 = vmatprep.subr.bf16.mxu1 %v560_v33 }
  0x57   :  { %528 = vmatpush3.bf16.msra.mxu0 %v557_v9  ;;  %p657_p8 = pnand %p656_p7, %p650_p4 }
  0x58   :  { %529 = vmatprep.subr.bf16.mxu0 %v558_v10 }
  0x59   :  { %538 = vmatpush3.bf16.msra.mxu1 %v560_v33 }
  0x5b   :  { %530 = vmatpush3.bf16.msra.mxu0 %v558_v10 }
 0x127   :  { %v525_v12 = vpop.f32.mrb[0].mxu1 }
 0x128   :  { %v244_v13 = vadd.f32 %v525_v12, %v469_v11  ;;  %v235_v14 = vpop.f32.mrb[1].mxu1 }
 0x129   :  { %v236_v16 = vadd.f32 %v469_v11, %v235_v14  ;;  %v526_v17 = vpop.f32.mrb[2].mxu1  ;;  %v517_v19 = vpop.f32.mrb[0].mxu0 }
 0x12a   :  { %v238_v18 = vpop.f32.mrb[3].mxu1  ;;  %v170_v21 = vadd.f32 %v517_v19, %v464_v15  ;;  %v161_v22 = vpop.f32.mrb[1].mxu0  ;;  %v251_v23 = vmax.f32 %v244_v13, 0.0 }
 0x12b   :  { %v239_v20 = vadd.f32 %v469_v11, %v238_v18  ;;  %v162_v24 = vadd.f32 %v464_v15, %v161_v22  ;;  %v518_v25 = vpop.f32.mrb[2].mxu0  ;;  %v249_v26 = vmax.f32 %v236_v16, 0.0 }
 0x12c   :  { %177 = vst [vmem:[#allocation10 + $0x10] sm:$0xff] %v170_v21  ;;  %v164_v28 = vpop.f32.mrb[3].mxu0  ;;  %v253_v31 = vpack.c.bf16 %v251_v23, %v251_v23 }
 0x12d   :  { %v250_v27 = vmax.f32 %v239_v20, 0.0  ;;  %175 = vst [vmem:[#allocation10] sm:$0xff] %v162_v24  ;;  %v165_v29 = vadd.f32 %v464_v15, %v164_v28 }
 0x12f   :  { %v252_v30 = vpack.c.bf16 %v250_v27, %v249_v26  ;;  %176 = vst [vmem:[#allocation10 + $0x8] sm:$0xff] %v165_v29 }
 0x131   :  { %531 = vmatprep.mubr.msk.bf16.mxu0 %vm120_vm0, %v252_v30 }
 0x132   :  { %532 = vmatmul.mubr.msk.bf16.vlgmr.msra.gmra.mrb[4].mxu0 %vm120_vm0, %v253_v31 }
 0x205   :  { %v533_v35 = vpop.f32.mrb[4].mxu0 }
 0x206   :  { %v326_v36 = vadd.f32 %v533_v35, %v474_v34  ;;  %v317_v37 = vpop.f32.mrb[5].mxu0 }
 0x207   :  { %v318_v38 = vadd.f32 %v474_v34, %v317_v37  ;;  %v534_v39 = vpop.f32.mrb[6].mxu0 }
 0x208   :  { %v320_v40 = vpop.f32.mrb[7].mxu0  ;;  %v333_v42 = vmax.f32 %v326_v36, 0.0 }
 0x209   :  { %v321_v41 = vadd.f32 %v474_v34, %v320_v40  ;;  %v331_v43 = vmax.f32 %v318_v38, 0.0 }
 0x20a   :  { %v335_v46 = vpack.c.bf16 %v333_v42, %v333_v42 }
 0x20b   :  { %v332_v44 = vmax.f32 %v321_v41, 0.0 }
 0x20d   :  { %v334_v45 = vpack.c.bf16 %v332_v44, %v331_v43 }
 0x20f   :  { %539 = vmatprep.mubr.msk.bf16.mxu1 %vm120_vm0, %v334_v45 }
 0x210   :  { %540 = vmatmul.mubr.msk.bf16.vlgmr.msra.gmra.mrb[4].mxu1 %vm120_vm0, %v335_v46 }
 0x211   :  { %660 = shalt.err (!%p657_p8)
}
 0x212   :  { %s661_s17 = scalar_lea.hbm %s900_s9, 384 }
 0x213   :  { %p662_p9 = scmp.ne.s32.totalorder %s900_s9, %s661_s17  ;;  %p665_p10 = scmp.lt.u32.totalorder %s661_s17, %s900_s9 }
 0x215   :  { %p667_p11 = pnand %p665_p10, %p662_p9 }
 0x217   :  { %670 = shalt.err (!%p667_p11)
}
 0x218   :  { %440 = dma.vmem_to_hbm [thread:$0]  %s435_s28, 384, %s900_s9, [#allocation4], %s707_s1, %s707_s1, %s708_s14  }
 0x219   :  { %v479_v47 = vld [vmem:[%s899_s8] ss:$0 sm:$0xff]  ;;  %s712_s7 = smov [#allocation11]  }
 0x21a   :  { %s446_s25 = sshll.u32 %s712_s7, 4  ;;  %s447_s25 = int_to_ptr.vmem [resolvable:$true] %s446_s25 }
 0x21b   :  { %s671_s29 = scalar_lea.vmem %s447_s25, 192  ;;  %p676_p13 = scmp.lt.s32.totalorder %s447_s25, %s447_s25 }
 0x21c   :  { %p672_p12 = scmp.ne.s32.totalorder %s447_s25, %s671_s29  ;;  %p677_p0 = scmp.lt.s32.totalorder %s671_s29, %s671_s29 }
 0x21e   :  { %p678_p1 = por %p677_p0, %p676_p13 }
 0x220   :  { %p679_p2 = pnand %p678_p1, %p672_p12 }
 0x2e3   :  { %v541_v48 = vpop.f32.mrb[4].mxu1 }
 0x2e4   :  { %v408_v49 = vadd.f32 %v541_v48, %v479_v47  ;;  %v399_v50 = vpop.f32.mrb[5].mxu1 }
 0x2e5   :  { %v542_v51 = vpop.f32.mrb[6].mxu1  ;;  %v400_v54 = vadd.f32 %v479_v47, %v399_v50 }
 0x2e6   :  { %v489_v52 = vpack.c.bf16 %v408_v49, %v408_v49  ;;  %v402_v53 = vpop.f32.mrb[7].mxu1 }
 0x2e7   :  { %v403_v55 = vadd.f32 %v479_v47, %v402_v53 }
 0x2e8   :  { %428 = vst [vmem:[#allocation11 + $0x8] sm:$0xf] %v489_v52 }
 0x2e9   :  { %v493_v56 = vpack.c.bf16 %v403_v55, %v400_v54 }
 0x2eb   :  { %494 = vst [vmem:[#allocation11] sm:$0xff] %v493_v56  }
 0x2ec   :  { %682 = shalt.err (!%p679_p2)
}
 0x2ed   :  { %s683_s1 = scalar_lea.hbm %s901_s10, 192 }
 0x2ee   :  { %p684_p3 = scmp.ne.s32.totalorder %s901_s10, %s683_s1  ;;  %p687_p4 = scmp.lt.u32.totalorder %s683_s1, %s901_s10 }
 0x2f0   :  { %p689_p5 = pnand %p687_p4, %p684_p3 }
 0x2f2   :  { %692 = shalt.err (!%p689_p5)
}
 0x2f3   :  { %452 = dma.vmem_to_hbm [thread:$0]  %s447_s25, 192, %s901_s10, [#allocation12], %s704_s23, %s704_s23, %s705_s24  }
 0x2f4   :  { %699 = dma.done.wait [#allocation4], 384  }
 0x2f5   :  { %700 = vsyncadd [#allocation4], 4294966912 }
 0x2f6   :  { %701 = dma.done.wait [#allocation12], 192  }
 0x2f7   :  { %702 = vsyncadd [#allocation12], 4294967104 }
 0x2f8   :  { %459 = vsyncpa [#allocation3], 1 }
 0x2f9   :  { %460 = vsyncpa [#allocation6], 1 }
 0x2fa   :  { %461 = vsyncpa [#allocation9], 1 }
 0x2fb   :  { %462 = vsyncpa [#allocation4], 1 }
 0x2fc   :  { %463 = vsyncpa [#allocation12], 1 }

</bundles_post_ra>
